<compile_context>
chip_gen: v6e
topology: v6e:2x2x1
jax: 0.10.0
libtpu: 0.0.40
codegen_flags: <defaults>
</compile_context>

<pallas_src>
import math
import functools

import jax
import jax.numpy as jnp
from jax.experimental import pallas as pl
from jax.experimental.pallas import tpu as pltpu


def _mha_kernel(*refs, n_head, d_k, has_mask, compute_dtype):
    if has_mask:
        (q_ref, k_ref, v_ref,
         wq_ref, bq_ref, wk_ref, bk_ref, wv_ref, bv_ref,
         wo_ref, bo_ref, mask_ref,
         o_ref, ctx_ref) = refs
    else:
        (q_ref, k_ref, v_ref,
         wq_ref, bq_ref, wk_ref, bk_ref, wv_ref, bv_ref,
         wo_ref, bo_ref,
         o_ref, ctx_ref) = refs
        mask_ref = None

    cdt = compute_dtype
    f32_min = float(jnp.finfo(jnp.float32).min)

    # ---- Full-width projections, once per batch (full MXU N-utilization). ----
    xq = q_ref[...].astype(cdt)          # (T1, F) — one cast per batch
    xk = k_ref[...].astype(cdt)          # (T2, F)
    xv = v_ref[...].astype(cdt)          # (T2, F)

    # Wq / bq already carry the 1/sqrt(d_k) scale (folded at param-prep time).
    q = (jnp.dot(xq, wq_ref[...], preferred_element_type=jnp.float32)
         + bq_ref[...]).astype(cdt)                              # (T1, F)
    k = (jnp.dot(xk, wk_ref[...], preferred_element_type=jnp.float32)
         + bk_ref[...])                                          # (T2, F) f32
    v = (jnp.dot(xv, wv_ref[...], preferred_element_type=jnp.float32)
         + bv_ref[...]).astype(cdt)                              # (T2, F)

    # Transpose K once per batch (f32), so no per-head XLU transpose is needed
    # inside the head loop.
    k_t = k.T.astype(cdt)                                        # (F, T2)

    if has_mask:
        invalid = mask_ref[...] == 0                             # (T1, T2) bool

    # ---- Per-head attention: static unroll, static lane slices. ----
    for h in range(n_head):
        sl = slice(h * d_k, (h + 1) * d_k)
        # scores (T1, T2), f32 accumulation on the MXU.
        scores = jnp.dot(q[:, sl], k_t[sl, :],
                         preferred_element_type=jnp.float32)
        if has_mask:
            scores = jnp.where(invalid, f32_min, scores)

        # Numerically stable softmax; the divide goes to the EUP.
        m = jnp.max(scores, axis=-1, keepdims=True)
        e = jnp.exp(scores - m)
        denom = jnp.sum(e, axis=-1, keepdims=True)
        attn = e * pl.reciprocal(denom, approx=True)
        if has_mask:
            # torch: softmax(scores).masked_fill(mask, 0.0) — also makes
            # fully-masked query rows exactly zero.
            attn = jnp.where(invalid, 0.0, attn)

        # (dropout is identity at inference / p = 0)
        ctx_ref[:, sl] = jnp.dot(attn.astype(cdt), v[:, sl],
                                 preferred_element_type=jnp.float32)  # (T1,d_k)

    # ---- Single full-width output projection (contraction K = F). ----
    o_ref[...] = (jnp.dot(ctx_ref[...].astype(cdt), wo_ref[...],
                          preferred_element_type=jnp.float32)
                  + bo_ref[...]).astype(o_ref.dtype)


def prepare_params(params, *, n_head, compute_dtype=jnp.float32):
    """Init-time relayout of torch.nn.Linear params (weight (out,in), bias (out,)).

    Returns W.T blocks in compute_dtype and f32 row-biases; folds the
    1/sqrt(d_k) attention scale into the Q projection so the kernel never
    rescales.  Call this once at parameter load, not per forward.
    """
    F = params["wq"].shape[0]
    assert F % n_head == 0
    d_k = F // n_head
    scale = 1.0 / math.sqrt(d_k)
    return {
        "wqT": (params["wq"].T * scale).astype(compute_dtype),   # (F, F)
        "bq": (params["bq"] * scale).reshape(1, F).astype(jnp.float32),
        "wkT": params["wk"].T.astype(compute_dtype),
        "bk": params["bk"].reshape(1, F).astype(jnp.float32),
        "wvT": params["wv"].T.astype(compute_dtype),
        "bv": params["bv"].reshape(1, F).astype(jnp.float32),
        "woT": params["wo"].T.astype(compute_dtype),
        "bo": params["bo"].reshape(1, F).astype(jnp.float32),
    }


def _vmem_limit_bytes():
    """Derive the scoped-VMEM limit from the chip (64 MiB v7x vs 128 MiB v5e/v6e)."""
    try:
        info = pltpu.get_tpu_info()
        cap = getattr(info, "vmem_capacity_bytes", None)
        if cap:
            return int(min(cap * 3 // 4, 100 * 1024 * 1024))
    except Exception:
        pass
    return 48 * 1024 * 1024


def multi_headed_attention(query, key, value, prepared, *, n_head, mask=None,
                           compute_dtype=jnp.float32):
    """query (B,T1,F), key/value (B,T2,F) f32; `prepared` from prepare_params()."""
    B, T1, F = query.shape
    _, T2, _ = key.shape
    assert F % n_head == 0
    d_k = F // n_head
    cdt = compute_dtype

    # Activations / mask / output: per-batch blocks.
    q_spec = pl.BlockSpec((None, T1, F), lambda b: (b, 0, 0))
    kv_spec = pl.BlockSpec((None, T2, F), lambda b: (b, 0, 0))
    out_spec = pl.BlockSpec((None, T1, F), lambda b: (b, 0, 0))
    # Weights / biases: constant block index -> fetched once, VMEM-resident.
    w_spec = pl.BlockSpec((F, F), lambda b: (0, 0))
    b_spec = pl.BlockSpec((1, F), lambda b: (0, 0))

    in_specs = [q_spec, kv_spec, kv_spec,
                w_spec, b_spec, w_spec, b_spec, w_spec, b_spec,
                w_spec, b_spec]
    inputs = [query, key, value,
              prepared["wqT"], prepared["bq"],
              prepared["wkT"], prepared["bk"],
              prepared["wvT"], prepared["bv"],
              prepared["woT"], prepared["bo"]]

    has_mask = mask is not None
    if has_mask:
        in_specs.append(pl.BlockSpec((None, T1, T2), lambda b: (b, 0, 0)))
        inputs.append((mask != 0).astype(jnp.int8))    # int8: 4x less traffic

    # Advisory cost estimate for XLA's scheduler.
    itemsize = jnp.dtype(cdt).itemsize
    flops = B * (4 * F * F * (T1 + T2) + 4 * T1 * T2 * F)
    bytes_accessed = 4 * B * (2 * T1 * F + 2 * T2 * F)       # q, k, v, out (f32)
    bytes_accessed += 4 * F * F * itemsize + 4 * 4 * F       # weights (once) + biases
    if has_mask:
        bytes_accessed += B * T1 * T2                        # int8 mask
    cost = pl.CostEstimate(flops=int(flops),
                           transcendentals=int(B * n_head * T1 * T2),
                           bytes_accessed=int(bytes_accessed))

    kernel = functools.partial(_mha_kernel, n_head=n_head, d_k=d_k,
                               has_mask=has_mask, compute_dtype=cdt)

    return pl.pallas_call(
        kernel,
        out_shape=jax.ShapeDtypeStruct((B, T1, F), query.dtype),
        grid_spec=pltpu.PrefetchScalarGridSpec(
            num_scalar_prefetch=0,
            grid=(B,),
            in_specs=in_specs,
            out_specs=out_spec,
            scratch_shapes=[pltpu.VMEM((T1, F), jnp.float32)],   # per-head ctx columns
        ),
        compiler_params=pltpu.CompilerParams(
            dimension_semantics=("parallel",),
            vmem_limit_bytes=_vmem_limit_bytes(),
        ),
        cost_estimate=cost,
    )(*inputs)


def _reference_mha(query, key, value, params, *, n_head, mask=None):
    """Pure-JAX reference mirroring the PyTorch forward (eval mode)."""
    B, T1, F = query.shape
    d_k = F // n_head

    def lin(x, w, b):
        return jnp.einsum('btf,gf->btg', x, w) + b

    q = lin(query, params["wq"], params["bq"]).reshape(B, T1, n_head, d_k).transpose(0, 2, 1, 3)
    k = lin(key,   params["wk"], params["bk"]).reshape(B, -1, n_head, d_k).transpose(0, 2, 1, 3)
    v = lin(value, params["wv"], params["bv"]).reshape(B, -1, n_head, d_k).transpose(0, 2, 1, 3)
    scores = jnp.einsum('bhtd,bhsd->bhts', q, k) / math.sqrt(d_k)
    if mask is not None:
        inval = (mask[:, None, :, :] == 0)
        scores = jnp.where(inval, float(jnp.finfo(scores.dtype).min), scores)
        attn = jax.nn.softmax(scores, axis=-1)
        attn = jnp.where(inval, 0.0, attn)
    else:
        attn = jax.nn.softmax(scores, axis=-1)
    x = jnp.einsum('bhts,bhsd->bhtd', attn, v)
    x = x.transpose(0, 2, 1, 3).reshape(B, T1, F)
    return jnp.einsum('btf,gf->btg', x, params["wo"]) + params["bo"]


if __name__ == "__main__":
    # Small deterministic config: n_head=4, n_feat=32, dropout=0.0, B=2, T=8
    # NOTE: F=32 is below lane width (128) so stores are masked; real configs
    # should keep F a multiple of 128.
    n_head, n_feat = 4, 32
    B, T1, T2 = 2, 8, 8

    key0 = jax.random.PRNGKey(0)
    keys = jax.random.split(key0, 16)

    # torch.nn.Linear-shaped params: weight (out, in), bias (out,)
    s = 1.0 / math.sqrt(n_feat)
    params = {
        "wq": jax.random.uniform(keys[0], (n_feat, n_feat), jnp.float32, -s, s),
        "bq": jax.random.uniform(keys[1], (n_feat,), jnp.float32, -s, s),
        "wk": jax.random.uniform(keys[2], (n_feat, n_feat), jnp.float32, -s, s),
        "bk": jax.random.uniform(keys[3], (n_feat,), jnp.float32, -s, s),
        "wv": jax.random.uniform(keys[4], (n_feat, n_feat), jnp.float32, -s, s),
        "bv": jax.random.uniform(keys[5], (n_feat,), jnp.float32, -s, s),
        "wo": jax.random.uniform(keys[6], (n_feat, n_feat), jnp.float32, -s, s),
        "bo": jax.random.uniform(keys[7], (n_feat,), jnp.float32, -s, s),
    }

    query = jax.random.normal(keys[8], (B, T1, n_feat), jnp.float32)
    key_in = jax.random.normal(keys[9], (B, T2, n_feat), jnp.float32)
    value = jax.random.normal(keys[10], (B, T2, n_feat), jnp.float32)

    # Init-time weight relayout (once, outside the per-call hot path).
    prep_f32 = prepare_params(params, n_head=n_head, compute_dtype=jnp.float32)
    prep_bf16 = prepare_params(params, n_head=n_head, compute_dtype=jnp.bfloat16)

    # 1) Unmasked self-attention, fp32 MXU path.
    #    (tolerance accounts for the EUP approximate reciprocal in softmax)
    out = multi_headed_attention(query, key_in, value, prep_f32, n_head=n_head,
                                 compute_dtype=jnp.float32)
    out = jax.block_until_ready(out)
    ref = _reference_mha(query, key_in, value, params, n_head=n_head)
    assert out.shape == (B, T1, n_feat)
    assert jnp.allclose(out, ref, atol=5e-3, rtol=5e-3), "fp32 mismatch vs reference"

    # 2) Masked path (torch masked_fill semantics, int8 mask transport).
    mask = (jax.random.uniform(keys[11], (B, T1, T2)) > 0.3).astype(jnp.int32)
    out_m = jax.block_until_ready(
        multi_headed_attention(query, key_in, value, prep_f32, n_head=n_head,
                               mask=mask, compute_dtype=jnp.float32))
    ref_m = _reference_mha(query, key_in, value, params, n_head=n_head, mask=mask)
    assert jnp.allclose(out_m, ref_m, atol=5e-3, rtol=5e-3), "masked mismatch vs reference"

    # 3) Cross-attention (T1 != T2) with bf16 MXU operands (performance path).
    key_x = jax.random.normal(keys[12], (B, 16, n_feat), jnp.float32)
    value_x = jax.random.normal(keys[13], (B, 16, n_feat), jnp.float32)
    out_bf = jax.block_until_ready(
        multi_headed_attention(query, key_x, value_x, prep_bf16, n_head=n_head,
                               compute_dtype=jnp.bfloat16))
    ref_x = _reference_mha(query, key_x, value_x, params, n_head=n_head)
    assert out_bf.shape == (B, T1, n_feat)
    assert float(jnp.max(jnp.abs(out_bf - ref_x))) < 5e-2, "bf16 mismatch vs reference"

    print("KERNEL_OK")
</pallas_src>

<mosaic_0001>
module attributes {stable_mosaic.version = 11 : i64} {
  func.func @_mha_kernel(%arg0: i32, %arg1: memref<1x8x32xf32, #tpu.memory_space<vmem>>, %arg2: memref<1x8x32xf32, #tpu.memory_space<vmem>>, %arg3: memref<1x8x32xf32, #tpu.memory_space<vmem>>, %arg4: memref<32x32xf32, #tpu.memory_space<vmem>>, %arg5: memref<1x32xf32, #tpu.memory_space<vmem>>, %arg6: memref<32x32xf32, #tpu.memory_space<vmem>>, %arg7: memref<1x32xf32, #tpu.memory_space<vmem>>, %arg8: memref<32x32xf32, #tpu.memory_space<vmem>>, %arg9: memref<1x32xf32, #tpu.memory_space<vmem>>, %arg10: memref<32x32xf32, #tpu.memory_space<vmem>>, %arg11: memref<1x32xf32, #tpu.memory_space<vmem>>, %arg12: memref<1x8x32xf32, #tpu.memory_space<vmem>>, %arg13: memref<8x32xf32, #tpu.memory_space<vmem>>) attributes {dimension_semantics = [#tpu.dimension_semantics<parallel>], iteration_bounds = array<i64: 2>, scalar_prefetch = 0 : i64, scratch_operands = 1 : i64, tpu.core_type = #tpu.core_type<tc>, window_params = [{transform_indices = @transform_0, window_bounds = array<i64: 1, 8, 32>}, {transform_indices = @transform_1, window_bounds = array<i64: 1, 8, 32>}, {transform_indices = @transform_2, window_bounds = array<i64: 1, 8, 32>}, {pipeline_mode = #tpu.pipeline_mode<synchronous>, transform_indices = @transform_3, window_bounds = array<i64: 32, 32>}, {pipeline_mode = #tpu.pipeline_mode<synchronous>, transform_indices = @transform_4, window_bounds = array<i64: 1, 32>}, {pipeline_mode = #tpu.pipeline_mode<synchronous>, transform_indices = @transform_5, window_bounds = array<i64: 32, 32>}, {pipeline_mode = #tpu.pipeline_mode<synchronous>, transform_indices = @transform_6, window_bounds = array<i64: 1, 32>}, {pipeline_mode = #tpu.pipeline_mode<synchronous>, transform_indices = @transform_7, window_bounds = array<i64: 32, 32>}, {pipeline_mode = #tpu.pipeline_mode<synchronous>, transform_indices = @transform_8, window_bounds = array<i64: 1, 32>}, {pipeline_mode = #tpu.pipeline_mode<synchronous>, transform_indices = @transform_9, window_bounds = array<i64: 32, 32>}, {pipeline_mode = #tpu.pipeline_mode<synchronous>, transform_indices = @transform_10, window_bounds = array<i64: 1, 32>}, {transform_indices = @transform_11, window_bounds = array<i64: 1, 8, 32>}]} {
    %c0 = arith.constant 0 : index
    %c0_0 = arith.constant 0 : index
    %c0_1 = arith.constant 0 : index
    %0 = vector.load %arg1[%c0, %c0_0, %c0_1] : memref<1x8x32xf32, #tpu.memory_space<vmem>>, vector<1x8x32xf32>
    %1 = vector.shape_cast %0 : vector<1x8x32xf32> to vector<8x32xf32>
    %c0_2 = arith.constant 0 : index
    %c0_3 = arith.constant 0 : index
    %c0_4 = arith.constant 0 : index
    %2 = vector.load %arg2[%c0_2, %c0_3, %c0_4] : memref<1x8x32xf32, #tpu.memory_space<vmem>>, vector<1x8x32xf32>
    %3 = vector.shape_cast %2 : vector<1x8x32xf32> to vector<8x32xf32>
    %c0_5 = arith.constant 0 : index
    %c0_6 = arith.constant 0 : index
    %c0_7 = arith.constant 0 : index
    %4 = vector.load %arg3[%c0_5, %c0_6, %c0_7] : memref<1x8x32xf32, #tpu.memory_space<vmem>>, vector<1x8x32xf32>
    %5 = vector.shape_cast %4 : vector<1x8x32xf32> to vector<8x32xf32>
    %c0_8 = arith.constant 0 : index
    %c0_9 = arith.constant 0 : index
    %6 = vector.load %arg4[%c0_8, %c0_9] : memref<32x32xf32, #tpu.memory_space<vmem>>, vector<32x32xf32>
    %cst = arith.constant dense<0.000000e+00> : vector<8x32xf32>
    %7 = tpu.matmul %1, %6, %cst {dimension_numbers = #tpu.dot_dimension_numbers<[1], [0], [0], [1], [0, 0, 1, 1], [], []>} : vector<8x32xf32>, vector<32x32xf32>, vector<8x32xf32> -> vector<8x32xf32>
    %c0_10 = arith.constant 0 : index
    %c0_11 = arith.constant 0 : index
    %8 = vector.load %arg5[%c0_10, %c0_11] : memref<1x32xf32, #tpu.memory_space<vmem>>, vector<1x32xf32>
    %9 = vector.broadcast %8 : vector<1x32xf32> to vector<8x32xf32>
    %10 = arith.addf %7, %9 : vector<8x32xf32>
    %c0_12 = arith.constant 0 : index
    %c0_13 = arith.constant 0 : index
    %11 = vector.load %arg6[%c0_12, %c0_13] : memref<32x32xf32, #tpu.memory_space<vmem>>, vector<32x32xf32>
    %cst_14 = arith.constant dense<0.000000e+00> : vector<8x32xf32>
    %12 = tpu.matmul %3, %11, %cst_14 {dimension_numbers = #tpu.dot_dimension_numbers<[1], [0], [0], [1], [0, 0, 1, 1], [], []>} : vector<8x32xf32>, vector<32x32xf32>, vector<8x32xf32> -> vector<8x32xf32>
    %c0_15 = arith.constant 0 : index
    %c0_16 = arith.constant 0 : index
    %13 = vector.load %arg7[%c0_15, %c0_16] : memref<1x32xf32, #tpu.memory_space<vmem>>, vector<1x32xf32>
    %14 = vector.broadcast %13 : vector<1x32xf32> to vector<8x32xf32>
    %15 = arith.addf %12, %14 : vector<8x32xf32>
    %c0_17 = arith.constant 0 : index
    %c0_18 = arith.constant 0 : index
    %16 = vector.load %arg8[%c0_17, %c0_18] : memref<32x32xf32, #tpu.memory_space<vmem>>, vector<32x32xf32>
    %cst_19 = arith.constant dense<0.000000e+00> : vector<8x32xf32>
    %17 = tpu.matmul %5, %16, %cst_19 {dimension_numbers = #tpu.dot_dimension_numbers<[1], [0], [0], [1], [0, 0, 1, 1], [], []>} : vector<8x32xf32>, vector<32x32xf32>, vector<8x32xf32> -> vector<8x32xf32>
    %c0_20 = arith.constant 0 : index
    %c0_21 = arith.constant 0 : index
    %18 = vector.load %arg9[%c0_20, %c0_21] : memref<1x32xf32, #tpu.memory_space<vmem>>, vector<1x32xf32>
    %19 = vector.broadcast %18 : vector<1x32xf32> to vector<8x32xf32>
    %20 = arith.addf %17, %19 : vector<8x32xf32>
    %21 = tpu.transpose %15, [1, 0] : vector<8x32xf32> -> vector<32x8xf32>
    %22 = vector.extract_strided_slice %10 {offsets = [0, 0], sizes = [8, 8], strides = [1, 1]} : vector<8x32xf32> to vector<8x8xf32>
    %23 = vector.extract_strided_slice %21 {offsets = [0, 0], sizes = [8, 8], strides = [1, 1]} : vector<32x8xf32> to vector<8x8xf32>
    %cst_22 = arith.constant dense<0.000000e+00> : vector<8x8xf32>
    %24 = tpu.matmul %22, %23, %cst_22 {dimension_numbers = #tpu.dot_dimension_numbers<[1], [0], [0], [1], [0, 0, 1, 1], [], []>} : vector<8x8xf32>, vector<8x8xf32>, vector<8x8xf32> -> vector<8x8xf32>
    %cst_23 = arith.constant dense<0xFF800000> : vector<8xf32>
    %25 = vector.multi_reduction <maximumf>, %24, %cst_23 [1] : vector<8x8xf32> to vector<8xf32>
    %26 = vector.shape_cast %25 : vector<8xf32> to vector<8x1xf32>
    %27 = vector.broadcast %26 : vector<8x1xf32> to vector<8x8xf32>
    %28 = arith.subf %24, %27 : vector<8x8xf32>
    %29 = math.exp %28 : vector<8x8xf32>
    %cst_24 = arith.constant dense<0.000000e+00> : vector<8xf32>
    %30 = vector.multi_reduction <add>, %29, %cst_24 [1] : vector<8x8xf32> to vector<8xf32>
    %31 = vector.shape_cast %30 : vector<8xf32> to vector<8x1xf32>
    %32 = tpu.reciprocal %31 {approx = true} : vector<8x1xf32> -> vector<8x1xf32>
    %33 = vector.broadcast %32 : vector<8x1xf32> to vector<8x8xf32>
    %34 = arith.mulf %29, %33 : vector<8x8xf32>
    %35 = vector.extract_strided_slice %20 {offsets = [0, 0], sizes = [8, 8], strides = [1, 1]} : vector<8x32xf32> to vector<8x8xf32>
    %cst_25 = arith.constant dense<0.000000e+00> : vector<8x8xf32>
    %36 = tpu.matmul %34, %35, %cst_25 {dimension_numbers = #tpu.dot_dimension_numbers<[1], [0], [0], [1], [0, 0, 1, 1], [], []>} : vector<8x8xf32>, vector<8x8xf32>, vector<8x8xf32> -> vector<8x8xf32>
    %c0_26 = arith.constant 0 : index
    %c0_27 = arith.constant 0 : index
    %37 = vector.load %arg13[%c0_26, %c0_27] : memref<8x32xf32, #tpu.memory_space<vmem>>, vector<8x8xf32>
    tpu.vector_store %arg13[%c0_26, %c0_27], %36 {strides = array<i32>} : memref<8x32xf32, #tpu.memory_space<vmem>>, vector<8x8xf32>,
    %38 = vector.extract_strided_slice %10 {offsets = [0, 8], sizes = [8, 8], strides = [1, 1]} : vector<8x32xf32> to vector<8x8xf32>
    %39 = vector.extract_strided_slice %21 {offsets = [8, 0], sizes = [8, 8], strides = [1, 1]} : vector<32x8xf32> to vector<8x8xf32>
    %cst_28 = arith.constant dense<0.000000e+00> : vector<8x8xf32>
    %40 = tpu.matmul %38, %39, %cst_28 {dimension_numbers = #tpu.dot_dimension_numbers<[1], [0], [0], [1], [0, 0, 1, 1], [], []>} : vector<8x8xf32>, vector<8x8xf32>, vector<8x8xf32> -> vector<8x8xf32>
    %cst_29 = arith.constant dense<0xFF800000> : vector<8xf32>
    %41 = vector.multi_reduction <maximumf>, %40, %cst_29 [1] : vector<8x8xf32> to vector<8xf32>
    %42 = vector.shape_cast %41 : vector<8xf32> to vector<8x1xf32>
    %43 = vector.broadcast %42 : vector<8x1xf32> to vector<8x8xf32>
    %44 = arith.subf %40, %43 : vector<8x8xf32>
    %45 = math.exp %44 : vector<8x8xf32>
    %cst_30 = arith.constant dense<0.000000e+00> : vector<8xf32>
    %46 = vector.multi_reduction <add>, %45, %cst_30 [1] : vector<8x8xf32> to vector<8xf32>
    %47 = vector.shape_cast %46 : vector<8xf32> to vector<8x1xf32>
    %48 = tpu.reciprocal %47 {approx = true} : vector<8x1xf32> -> vector<8x1xf32>
    %49 = vector.broadcast %48 : vector<8x1xf32> to vector<8x8xf32>
    %50 = arith.mulf %45, %49 : vector<8x8xf32>
    %51 = vector.extract_strided_slice %20 {offsets = [0, 8], sizes = [8, 8], strides = [1, 1]} : vector<8x32xf32> to vector<8x8xf32>
    %cst_31 = arith.constant dense<0.000000e+00> : vector<8x8xf32>
    %52 = tpu.matmul %50, %51, %cst_31 {dimension_numbers = #tpu.dot_dimension_numbers<[1], [0], [0], [1], [0, 0, 1, 1], [], []>} : vector<8x8xf32>, vector<8x8xf32>, vector<8x8xf32> -> vector<8x8xf32>
    %c0_32 = arith.constant 0 : index
    %c8 = arith.constant 8 : index
    %53 = vector.load %arg13[%c0_32, %c8] : memref<8x32xf32, #tpu.memory_space<vmem>>, vector<8x8xf32>
    tpu.vector_store %arg13[%c0_32, %c8], %52 {strides = array<i32>} : memref<8x32xf32, #tpu.memory_space<vmem>>, vector<8x8xf32>,
    %54 = vector.extract_strided_slice %10 {offsets = [0, 16], sizes = [8, 8], strides = [1, 1]} : vector<8x32xf32> to vector<8x8xf32>
    %55 = vector.extract_strided_slice %21 {offsets = [16, 0], sizes = [8, 8], strides = [1, 1]} : vector<32x8xf32> to vector<8x8xf32>
    %cst_33 = arith.constant dense<0.000000e+00> : vector<8x8xf32>
    %56 = tpu.matmul %54, %55, %cst_33 {dimension_numbers = #tpu.dot_dimension_numbers<[1], [0], [0], [1], [0, 0, 1, 1], [], []>} : vector<8x8xf32>, vector<8x8xf32>, vector<8x8xf32> -> vector<8x8xf32>
    %cst_34 = arith.constant dense<0xFF800000> : vector<8xf32>
    %57 = vector.multi_reduction <maximumf>, %56, %cst_34 [1] : vector<8x8xf32> to vector<8xf32>
    %58 = vector.shape_cast %57 : vector<8xf32> to vector<8x1xf32>
    %59 = vector.broadcast %58 : vector<8x1xf32> to vector<8x8xf32>
    %60 = arith.subf %56, %59 : vector<8x8xf32>
    %61 = math.exp %60 : vector<8x8xf32>
    %cst_35 = arith.constant dense<0.000000e+00> : vector<8xf32>
    %62 = vector.multi_reduction <add>, %61, %cst_35 [1] : vector<8x8xf32> to vector<8xf32>
    %63 = vector.shape_cast %62 : vector<8xf32> to vector<8x1xf32>
    %64 = tpu.reciprocal %63 {approx = true} : vector<8x1xf32> -> vector<8x1xf32>
    %65 = vector.broadcast %64 : vector<8x1xf32> to vector<8x8xf32>
    %66 = arith.mulf %61, %65 : vector<8x8xf32>
    %67 = vector.extract_strided_slice %20 {offsets = [0, 16], sizes = [8, 8], strides = [1, 1]} : vector<8x32xf32> to vector<8x8xf32>
    %cst_36 = arith.constant dense<0.000000e+00> : vector<8x8xf32>
    %68 = tpu.matmul %66, %67, %cst_36 {dimension_numbers = #tpu.dot_dimension_numbers<[1], [0], [0], [1], [0, 0, 1, 1], [], []>} : vector<8x8xf32>, vector<8x8xf32>, vector<8x8xf32> -> vector<8x8xf32>
    %c0_37 = arith.constant 0 : index
    %c16 = arith.constant 16 : index
    %69 = vector.load %arg13[%c0_37, %c16] : memref<8x32xf32, #tpu.memory_space<vmem>>, vector<8x8xf32>
    tpu.vector_store %arg13[%c0_37, %c16], %68 {strides = array<i32>} : memref<8x32xf32, #tpu.memory_space<vmem>>, vector<8x8xf32>,
    %70 = vector.extract_strided_slice %10 {offsets = [0, 24], sizes = [8, 8], strides = [1, 1]} : vector<8x32xf32> to vector<8x8xf32>
    %71 = vector.extract_strided_slice %21 {offsets = [24, 0], sizes = [8, 8], strides = [1, 1]} : vector<32x8xf32> to vector<8x8xf32>
    %cst_38 = arith.constant dense<0.000000e+00> : vector<8x8xf32>
    %72 = tpu.matmul %70, %71, %cst_38 {dimension_numbers = #tpu.dot_dimension_numbers<[1], [0], [0], [1], [0, 0, 1, 1], [], []>} : vector<8x8xf32>, vector<8x8xf32>, vector<8x8xf32> -> vector<8x8xf32>
    %cst_39 = arith.constant dense<0xFF800000> : vector<8xf32>
    %73 = vector.multi_reduction <maximumf>, %72, %cst_39 [1] : vector<8x8xf32> to vector<8xf32>
    %74 = vector.shape_cast %73 : vector<8xf32> to vector<8x1xf32>
    %75 = vector.broadcast %74 : vector<8x1xf32> to vector<8x8xf32>
    %76 = arith.subf %72, %75 : vector<8x8xf32>
    %77 = math.exp %76 : vector<8x8xf32>
    %cst_40 = arith.constant dense<0.000000e+00> : vector<8xf32>
    %78 = vector.multi_reduction <add>, %77, %cst_40 [1] : vector<8x8xf32> to vector<8xf32>
    %79 = vector.shape_cast %78 : vector<8xf32> to vector<8x1xf32>
    %80 = tpu.reciprocal %79 {approx = true} : vector<8x1xf32> -> vector<8x1xf32>
    %81 = vector.broadcast %80 : vector<8x1xf32> to vector<8x8xf32>
    %82 = arith.mulf %77, %81 : vector<8x8xf32>
    %83 = vector.extract_strided_slice %20 {offsets = [0, 24], sizes = [8, 8], strides = [1, 1]} : vector<8x32xf32> to vector<8x8xf32>
    %cst_41 = arith.constant dense<0.000000e+00> : vector<8x8xf32>
    %84 = tpu.matmul %82, %83, %cst_41 {dimension_numbers = #tpu.dot_dimension_numbers<[1], [0], [0], [1], [0, 0, 1, 1], [], []>} : vector<8x8xf32>, vector<8x8xf32>, vector<8x8xf32> -> vector<8x8xf32>
    %c0_42 = arith.constant 0 : index
    %c24 = arith.constant 24 : index
    %85 = vector.load %arg13[%c0_42, %c24] : memref<8x32xf32, #tpu.memory_space<vmem>>, vector<8x8xf32>
    tpu.vector_store %arg13[%c0_42, %c24], %84 {strides = array<i32>} : memref<8x32xf32, #tpu.memory_space<vmem>>, vector<8x8xf32>,
    %c0_43 = arith.constant 0 : index
    %c0_44 = arith.constant 0 : index
    %86 = vector.load %arg13[%c0_43, %c0_44] : memref<8x32xf32, #tpu.memory_space<vmem>>, vector<8x32xf32>
    %c0_45 = arith.constant 0 : index
    %c0_46 = arith.constant 0 : index
    %87 = vector.load %arg10[%c0_45, %c0_46] : memref<32x32xf32, #tpu.memory_space<vmem>>, vector<32x32xf32>
    %cst_47 = arith.constant dense<0.000000e+00> : vector<8x32xf32>
    %88 = tpu.matmul %86, %87, %cst_47 {dimension_numbers = #tpu.dot_dimension_numbers<[1], [0], [0], [1], [0, 0, 1, 1], [], []>} : vector<8x32xf32>, vector<32x32xf32>, vector<8x32xf32> -> vector<8x32xf32>
    %c0_48 = arith.constant 0 : index
    %c0_49 = arith.constant 0 : index
    %89 = vector.load %arg11[%c0_48, %c0_49] : memref<1x32xf32, #tpu.memory_space<vmem>>, vector<1x32xf32>
    %90 = vector.broadcast %89 : vector<1x32xf32> to vector<8x32xf32>
    %91 = arith.addf %88, %90 : vector<8x32xf32>
    %c0_50 = arith.constant 0 : index
    %c0_51 = arith.constant 0 : index
    %c0_52 = arith.constant 0 : index
    %92 = vector.load %arg12[%c0_50, %c0_51, %c0_52] : memref<1x8x32xf32, #tpu.memory_space<vmem>>, vector<1x8x32xf32>
    %93 = vector.shape_cast %92 : vector<1x8x32xf32> to vector<8x32xf32>
    %94 = vector.shape_cast %91 : vector<8x32xf32> to vector<1x8x32xf32>
    tpu.vector_store %arg12[%c0_50, %c0_51, %c0_52], %94 {strides = array<i32>} : memref<1x8x32xf32, #tpu.memory_space<vmem>>, vector<1x8x32xf32>,
    return
  }
  func.func @transform_0(%arg0: i32) -> (i32, i32, i32) {
    %c0_i32 = arith.constant 0 : i32
    %c0_i32_0 = arith.constant 0 : i32
    %c0_i32_1 = arith.constant 0 : i32
    return %arg0, %c0_i32, %c0_i32_0 : i32, i32, i32
  }
  func.func @transform_1(%arg0: i32) -> (i32, i32, i32) {
    %c0_i32 = arith.constant 0 : i32
    %c0_i32_0 = arith.constant 0 : i32
    %c0_i32_1 = arith.constant 0 : i32
    return %arg0, %c0_i32, %c0_i32_0 : i32, i32, i32
  }
  func.func @transform_2(%arg0: i32) -> (i32, i32, i32) {
    %c0_i32 = arith.constant 0 : i32
    %c0_i32_0 = arith.constant 0 : i32
    %c0_i32_1 = arith.constant 0 : i32
    return %arg0, %c0_i32, %c0_i32_0 : i32, i32, i32
  }
  func.func @transform_3(%arg0: i32) -> (i32, i32) {
    %c0_i32 = arith.constant 0 : i32
    %c0_i32_0 = arith.constant 0 : i32
    %c0_i32_1 = arith.constant 0 : i32
    return %c0_i32, %c0_i32_0 : i32, i32
  }
  func.func @transform_4(%arg0: i32) -> (i32, i32) {
    %c0_i32 = arith.constant 0 : i32
    %c0_i32_0 = arith.constant 0 : i32
    %c0_i32_1 = arith.constant 0 : i32
    return %c0_i32, %c0_i32_0 : i32, i32
  }
  func.func @transform_5(%arg0: i32) -> (i32, i32) {
    %c0_i32 = arith.constant 0 : i32
    %c0_i32_0 = arith.constant 0 : i32
    %c0_i32_1 = arith.constant 0 : i32
    return %c0_i32, %c0_i32_0 : i32, i32
  }
  func.func @transform_6(%arg0: i32) -> (i32, i32) {
    %c0_i32 = arith.constant 0 : i32
    %c0_i32_0 = arith.constant 0 : i32
    %c0_i32_1 = arith.constant 0 : i32
    return %c0_i32, %c0_i32_0 : i32, i32
  }
  func.func @transform_7(%arg0: i32) -> (i32, i32) {
    %c0_i32 = arith.constant 0 : i32
    %c0_i32_0 = arith.constant 0 : i32
    %c0_i32_1 = arith.constant 0 : i32
    return %c0_i32, %c0_i32_0 : i32, i32
  }
  func.func @transform_8(%arg0: i32) -> (i32, i32) {
    %c0_i32 = arith.constant 0 : i32
    %c0_i32_0 = arith.constant 0 : i32
    %c0_i32_1 = arith.constant 0 : i32
    return %c0_i32, %c0_i32_0 : i32, i32
  }
  func.func @transform_9(%arg0: i32) -> (i32, i32) {
    %c0_i32 = arith.constant 0 : i32
    %c0_i32_0 = arith.constant 0 : i32
    %c0_i32_1 = arith.constant 0 : i32
    return %c0_i32, %c0_i32_0 : i32, i32
  }
  func.func @transform_10(%arg0: i32) -> (i32, i32) {
    %c0_i32 = arith.constant 0 : i32
    %c0_i32_0 = arith.constant 0 : i32
    %c0_i32_1 = arith.constant 0 : i32
    return %c0_i32, %c0_i32_0 : i32, i32
  }
  func.func @transform_11(%arg0: i32) -> (i32, i32, i32) {
    %c0_i32 = arith.constant 0 : i32
    %c0_i32_0 = arith.constant 0 : i32
    %c0_i32_1 = arith.constant 0 : i32
    return %arg0, %c0_i32, %c0_i32_0 : i32, i32, i32
  }
}

</mosaic_0001>

<bundles_post_ra>
// kernel: tpu_custom_call.1
= control target key start
LH: loop header
LB: loop body
LE: loop exit
PB: predicated region body
PF: predicated region fallthrough
CT: control target
= control target key end

     0   :  { %s2735_s0 = inlined_call_operand.hbm [shape: f32[2,8,32], index: 0, kind: input, shape index: {}]   ;;  %s2736_s1 = inlined_call_operand.hbm [shape: f32[2,8,32], index: 1, kind: input, shape index: {}]   ;;  %s2737_s2 = inlined_call_operand.hbm [shape: f32[2,8,32], index: 2, kind: input, shape index: {}]   ;;  %s2738_s3 = inlined_call_operand.hbm [shape: f32[32,32], index: 3, kind: input, shape index: {}]   ;;  %s2739_s4 = inlined_call_operand.vmem [shape: f32[1,32], index: 4, kind: input, shape index: {}]   ;;  %s2740_s5 = inlined_call_operand.hbm [shape: f32[32,32], index: 5, kind: input, shape index: {}]   ;;  %s2741_s6 = inlined_call_operand.vmem [shape: f32[1,32], index: 6, kind: input, shape index: {}]   ;;  %s2742_s7 = inlined_call_operand.hbm [shape: f32[32,32], index: 7, kind: input, shape index: {}]   ;;  %s2743_s8 = inlined_call_operand.vmem [shape: f32[1,32], index: 8, kind: input, shape index: {}]   ;;  %s2744_s9 = inlined_call_operand.hbm [shape: f32[32,32], index: 9, kind: input, shape index: {}]   ;;  %s2745_s10 = inlined_call_operand.vmem [shape: f32[1,32], index: 10, kind: input, shape index: {}]   ;;  %s2746_s11 = inlined_call_operand.hbm [shape: f32[2,8,32], index: 11, kind: output, shape index: {}]  }
   0x1   :  { %2767 = sst [smem:[#allocation26_spill]] %s2735_s0 }
   0x2   :  { %2768 = sst [smem:[#allocation27_spill]] %s2736_s1 }
   0x3   :  { %2769 = sst [smem:[#allocation28_spill]] %s2738_s3 }
   0x4   :  { %2770 = sst [smem:[#allocation29_spill]] %s2742_s7 }
   0x5   :  { %2771 = sst [smem:[#allocation30_spill]] %s2745_s10 }
   0x6   :  { %2772 = sst [smem:[#allocation31_spill]] %s2746_s11 }
   0x7   :  { %16 = vsyncpa [#allocation4], 0 }
   0x8   :  { %18 = vsyncpa [#allocation4 + $0x1], 0 }
   0x9   :  { %19 = vsyncpa [#allocation7], 0 }
   0xa   :  { %21 = vsyncpa [#allocation7 + $0x1], 0 }
   0xb   :  { %22 = vsyncpa [#allocation10], 0 }
   0xc   :  { %23 = vsyncpa [#allocation13], 0 }
   0xd   :  { %24 = vsyncpa [#allocation5], 0 }
   0xe   :  { %26 = vsyncpa [#allocation5 + $0x1], 0  ;;  %s2347_s17 = smov 0   ;;  %s2349_s18 = smov 0  }
   0xf   :  { %s2351_s19 = smov 0   ;;  %s2353_s20 = smov 0  }
  0x10 LB: > { %2773 = sst [smem:[#allocation21_spill]] %s2255_s17  ;;  %s2269_s21 = smov [#allocation9]   ;;  %s2267_s20 = sphi %s2353_s20, %s2810_s20   ;;  %s2263_s19 = sphi %s2351_s19, %s2814_s19   ;;  %s2259_s18 = sphi %s2349_s18, %s2813_s18   ;;  %s2255_s17 = sphi %s2347_s17, %s2812_s17  }
  0x11   : > { %2774 = sst [smem:[#allocation22_spill]] %s2267_s20  ;;  %s321_s22 = sshll.u32 %s2269_s21, 4  ;;  %s322_s22 = int_to_ptr.vmem [resolvable:$true] %s321_s22 }
  0x12   : > { %s2368_s23 = sadd.s32 4294967295, %s2267_s20   ;;  %p1715_p0 = scmp.ge.s32.totalorder %s2267_s20, 1 }
  0x13   : > { %p2759_p1 = scmp.eq.s32.totalorder %s2368_s23, 0  ;;  %p309_p2 = scmp.lt.s32.totalorder %s2267_s20, 3 }
  0x14   : > { %s2270_s25 = smov [#allocation12]   ;;  %s2014_s28 = scalar_lea.vmem %s322_s22, 512 }
  0x15   : > { %p2373_p3 = pnand %p1715_p0, %p309_p2  ;;  %s353_s26 = sshll.u32 %s2270_s25, 4  ;;  %s354_s26 = int_to_ptr.vmem [resolvable:$true] %s353_s26 }
  0x16   : > { %p2015_p8 = scmp.ne.s32.totalorder %s322_s22, %s2014_s28  ;;  %p2022_p11 = scmp.lt.s32.totalorder %s322_s22, %s322_s22 }
  0x17   : > { %s2775_s24 = scalar_select %p2373_p3, 1, 0 }
  0x18   : > { %p1904_p5 = pneg %p2373_p3  ;;  %p2023_p12 = scmp.lt.s32.totalorder %s2014_s28, %s2014_s28 }
  0x1a   : > { %p2382_p6 = pnand %p1904_p5, %p2759_p1  ;;  %p2024_p13 = por %p2023_p12, %p2022_p11 }
  0x1c   : > { %s2776_s27 = scalar_select %p2382_p6, 1, 0 }
  0x1d   : > { %p2747_p7 = pneg %p2382_p6 }
  0x1f   : > { %p2017_p9 = pnand %p2015_p8, %p2747_p7 }
  0x21   : > { %p2018_p10 = pneg %p2017_p9 }
  0x23   : > { %p2025_p0 = pnand %p2024_p13, %p2018_p10 }
  0x25   : > { %2028 = shalt.err (!%p2025_p0)
}
  0x26   : > { %s2748_s29 = smov 128   ;;  %s2750_s30 = smov 8  }
  0x27   : > { %s2777_s3 = sld [smem:[#allocation28_spill]]  ;;  %s2040_s14 = scalar_lea.vmem %s354_s26, 512 }
  0x28   : > { %p2041_p2 = scmp.ne.s32.totalorder %s354_s26, %s2040_s14  ;;  %p2048_p9 = scmp.lt.s32.totalorder %s354_s26, %s354_s26 }
  0x29   : > { %p2049_p10 = scmp.lt.s32.totalorder %s2040_s14, %s2040_s14 }
  0x2a   : > { %p2043_p5 = pnand %p2041_p2, %p2747_p7 }
  0x2b   : > { %p2050_p11 = por %p2049_p10, %p2048_p9 }
  0x2c   : > { %p2044_p8 = pneg %p2043_p5 }
  0x2d   : > { %1907 = dma.hbm_to_vmem [thread:$0]  (!%p2382_p6), %s2777_s3, 512, %s322_s22, [#allocation10], %s2748_s29, %s2748_s29, %s2750_s30  }
  0x2e   : > { %p2051_p12 = pnand %p2050_p11, %p2044_p8 }
  0x30   : > { %2054 = shalt.err (!%p2051_p12)
}
  0x31   : > { %s2778_s7 = sld [smem:[#allocation29_spill]]  ;;  %s1714_s21 = sadd.s32 4294967294, %s2267_s20  }
  0x32   : > { %s2412_s22 = sadd.s32 1, %s2267_s20   ;;  %s39_s28 = sadd.s32 1, %s2263_s19 }
  0x33   : > { %2779 = sst [smem:[#allocation23_spill]] %s2412_s22  ;;  %s36_s25 = ssub.s32 %s2267_s20, %s2412_s22 }
  0x34   : > { %p37_p13 = scmp.eq.s32.totalorder %s36_s25, 0  ;;  %p46_p0 = scmp.ne.s32.totalorder %s2263_s19, %s2259_s18 }
  0x35   : > { %p47_p2 = scmp.eq.s32.totalorder %s2267_s20, 0  ;;  %p52_p5 = scmp.ne.s32.totalorder %s2259_s18, %s2255_s17 }
  0x36   : > { %s2423_s12 = scalar_select %p37_p13, %s2263_s19, %s39_s28  }
  0x37   : > { %1913 = dma.hbm_to_vmem [thread:$0]  (!%p2382_p6), %s2778_s7, 512, %s354_s26, [#allocation13], %s2748_s29, %s2748_s29, %s2750_s30  }
  0x38   : > { %2780 = sst [smem:[#allocation24_spill]] %s2423_s12  ;;  %p48_p8 = por %p47_p2, %p46_p0 }
  0x39   : > { %p2427_p9 = por %p2759_p1, %p52_p5  ;;  %p296_p10 = scmp.eq.s32.totalorder %s2368_s23, 1 }
  0x3a   : > { %p302_p11 = scmp.eq.s32.totalorder %s1714_s21, 1  ;;  %p1935_p12 = scmp.lt.s32.totalorder %s2267_s20, 2 }
  0x3b   : > { %s2781_s13 = scalar_select %p2427_p9, 1, 0 }
  0x3c   : > { %s2752_s26 = sand.u32 1, %s2263_s19   ;;  %p2434_p4 = por %p296_p10, %p46_p0 }
  0x3d   : > { %p2438_p7 = por %p302_p11, %p52_p5  ;;  %s2444_s16 = sshll.u32 %s2752_s26, 3 }
  0x3e   : > { %s2782_s14 = scalar_select %p2434_p4, 1, 0 }
  0x3f   : > { %s2783_s15 = scalar_select %p2438_p7, 1, 0 }
  0x40   : > { %s2447_s25 = sshll.u32 %s2267_s20, 7  ;;  %p2449_p13 = pnand %p1935_p12, %p48_p8 }
  0x41   : > { %2784 = sst [smem:[#allocation25_spill]] %s2783_s15  ;;  %s404_s21 = sand.u32 1, %s2267_s20  }
  0x42   : > { %s2786_s1 = sld [smem:[#allocation27_spill]]  ;;  %s408_s26 = scalar_lea.vmem [#allocation6], %s2444_s16 }
  0x43   : > { %s415_s7 = sshll.u32 %s408_s26, 4  ;;  %s2273_s12 = smov [#allocation11]   ;;  %s2461_s7 = int_to_ptr.vmem [resolvable:$true] %s415_s7 }
  0x44   : > { %s337_s22 = sshll.u32 %s2273_s12, 4  ;;  %s2463_s15 = scalar_lea.sflag [#allocation7], %s404_s21  ;;  %s338_s22 = int_to_ptr.vmem [resolvable:$true] %s337_s22 }
  0x45   : > { %p2469_p2 = pneg %p2449_p13 }
  0x47   : > { %s2787_s20 = scalar_select %p2469_p2, 1, 0 }
  0x48   : > { %s2458_s3 = scalar_lea.hbm %s2786_s1, %s2447_s25  ;;  %s2060_s26 = scalar_lea.hbm %s2786_s1, 256 }
  0x49   : > { %s2055_s17 = scalar_lea.hbm %s2458_s3, 128  ;;  %p2061_p10 = scmp.lt.s32.totalorder %s2458_s3, %s2786_s1 }
  0x4a   : > { %p2056_p0 = scmp.ne.s32.totalorder %s2458_s3, %s2055_s17  ;;  %p2062_p11 = scmp.lt.s32.totalorder %s2060_s26, %s2055_s17 }
  0x4c   : > { %p2058_p5 = pnand %p2469_p2, %p2056_p0  ;;  %p2063_p12 = por %p2062_p11, %p2061_p10 }
  0x4e   : > { %p2059_p8 = pneg %p2058_p5 }
  0x50   : > { %p2064_p1 = pnand %p2063_p12, %p2059_p8 }
  0x52   : > { %2067 = shalt.err (!%p2064_p1)
}
  0x53   : > { %s2068_s12 = scalar_lea.vmem %s2461_s7, 128  ;;  %s2274_s21 = smov [#allocation6]  }
  0x54   : > { %p2069_p7 = scmp.ne.s32.totalorder %s2461_s7, %s2068_s12  ;;  %s2073_s29 = sshll.u32 %s2274_s21, 4  ;;  %s2074_s29 = int_to_ptr.vmem [resolvable:$false] %s2073_s29 }
  0x55   : > { %s2075_s30 = scalar_lea.vmem %s2074_s29, 256  ;;  %p2076_p4 = scmp.lt.s32.totalorder %s2461_s7, %s2074_s29 }
  0x56   : > { %p2071_p0 = pnand %p2069_p7, %p2469_p2  ;;  %p2077_p9 = scmp.lt.s32.totalorder %s2075_s30, %s2068_s12 }
  0x58   : > { %p2072_p5 = pneg %p2071_p0  ;;  %p2078_p3 = por %p2077_p9, %p2076_p4 }
  0x5a   : > { %p2079_p6 = pnand %p2078_p3, %p2072_p5 }
  0x5c   : > { %2082 = shalt.err (!%p2079_p6)
}
  0x5d   : > { %1923 = dma.hbm_to_vmem [thread:$0]  (!%p2449_p13), %s2458_s3, 128, %s2461_s7, %s2463_s15  }
  0x5e   : > { %s2094_s10 = scalar_lea.vmem %s338_s22, 512  ;;  %p2788_p7 = scmp.ne.s32.totalorder %s2776_s27, 0 }
  0x5f   : > { %p2095_p1 = scmp.ne.s32.totalorder %s338_s22, %s2094_s10  ;;  %p2102_p12 = scmp.lt.s32.totalorder %s338_s22, %s338_s22 }
  0x60   : > { %p2789_p8 = pneg %p2788_p7  ;;  %p2103_p0 = scmp.lt.s32.totalorder %s2094_s10, %s2094_s10 }
  0x62   : > { %p2097_p10 = pnand %p2095_p1, %p2789_p8  ;;  %p2104_p2 = por %p2103_p0, %p2102_p12 }
  0x64   : > { %p2098_p11 = pneg %p2097_p10 }
  0x66   : > { %p2105_p4 = pnand %p2104_p2, %p2098_p11 }
  0x68   : > { %2108 = shalt.err (!%p2105_p4)
}
  0x69   : > { %s2790_s11 = smov 8   ;;  %s2791_s17 = smov 128  }
  0x6a   : > { %1910 = dma.hbm_to_vmem [thread:$0]  (!%p2788_p7), %s2740_s5, 512, %s338_s22, [#allocation10], %s2791_s17, %s2791_s17, %s2790_s11  }
  0x6b   : > { %s2275_s3 = smov [#allocation14]   ;;  %p2792_p6 = pmov %p2789_p8 }
  0x6c   : > { %s369_s7 = sshll.u32 %s2275_s3, 4  ;;  %s370_s7 = int_to_ptr.vmem [resolvable:$true] %s369_s7 }
  0x6d   : > { %s2120_s21 = scalar_lea.vmem %s370_s7, 512  ;;  %p2128_p5 = scmp.lt.s32.totalorder %s370_s7, %s370_s7 }
  0x6e   : > { %p2121_p3 = scmp.ne.s32.totalorder %s370_s7, %s2120_s21  ;;  %p2129_p1 = scmp.lt.s32.totalorder %s2120_s21, %s2120_s21 }
  0x70   : > { %p2123_p9 = pnand %p2121_p3, %p2792_p6  ;;  %p2130_p8 = por %p2129_p1, %p2128_p5 }
  0x72   : > { %p2124_p2 = pneg %p2123_p9 }
  0x74   : > { %p2131_p10 = pnand %p2130_p8, %p2124_p2 }
  0x76   : > { %2134 = shalt.err (!%p2131_p10)
}
  0x77   : > { %1916 = dma.hbm_to_vmem [thread:$0]  (!%p2788_p7), %s2744_s9, 512, %s370_s7, [#allocation13], %s2791_s17, %s2791_s17, %s2790_s11  }
  0x78   : > { %s2793_s0 = sld [smem:[#allocation26_spill]]  ;;  %s390_s27 = scalar_lea.vmem [#allocation3], %s2444_s16 }
  0x79   : > { %s397_s12 = sshll.u32 %s390_s27, 4  ;;  %s2794_s3 = sand.u32 1, %s2263_s19   ;;  %s398_s12 = int_to_ptr.vmem [resolvable:$true] %s397_s12 }
  0x7a   : > { %s387_s21 = scalar_lea.sflag [#allocation4], %s2794_s3  ;;  %p2795_p12 = scmp.ne.s32.totalorder %s2787_s20, 0 }
  0x7e   : > { %s2518_s26 = scalar_lea.hbm %s2793_s0, %s2447_s25  ;;  %s2140_s17 = scalar_lea.hbm %s2793_s0, 256 }
  0x7f   : > { %s2135_s1 = scalar_lea.hbm %s2518_s26, 128  ;;  %p2141_p7 = scmp.lt.s32.totalorder %s2518_s26, %s2793_s0 }
  0x80   : > { %p2136_p11 = scmp.ne.s32.totalorder %s2518_s26, %s2135_s1  ;;  %p2142_p3 = scmp.lt.s32.totalorder %s2140_s17, %s2135_s1 }
  0x82   : > { %p2138_p0 = pnand %p2136_p11, %p2795_p12  ;;  %p2143_p6 = por %p2142_p3, %p2141_p7 }
  0x84   : > { %p2139_p4 = pneg %p2138_p0 }
  0x86   : > { %p2144_p9 = pnand %p2143_p6, %p2139_p4 }
  0x88   : > { %2147 = shalt.err (!%p2144_p9)
}
  0x89   : > { %s2148_s30 = scalar_lea.vmem %s398_s12, 128  ;;  %s2276_s10 = smov [#allocation3]  }
  0x8a   : > { %p2149_p2 = scmp.ne.s32.totalorder %s398_s12, %s2148_s30  ;;  %s2153_s27 = sshll.u32 %s2276_s10, 4  ;;  %s2154_s27 = int_to_ptr.vmem [resolvable:$false] %s2153_s27 }
  0x8b   : > { %s2155_s3 = scalar_lea.vmem %s2154_s27, 256  ;;  %p2156_p8 = scmp.lt.s32.totalorder %s398_s12, %s2154_s27 }
  0x8c   : > { %p2151_p5 = pnand %p2149_p2, %p2795_p12  ;;  %p2157_p10 = scmp.lt.s32.totalorder %s2155_s3, %s2148_s30 }
  0x8e   : > { %p2152_p1 = pneg %p2151_p5  ;;  %p2158_p11 = por %p2157_p10, %p2156_p8 }
  0x90   : > { %p2159_p0 = pnand %p2158_p11, %p2152_p1 }
  0x92   : > { %2162 = shalt.err (!%p2159_p0)
}
  0x93   : > { %1920 = dma.hbm_to_vmem [thread:$0]  (!%p2449_p13), %s2518_s26, 128, %s398_s12, %s387_s21  }
  0x94   : > { %s431_s11 = scalar_lea.hbm %s2737_s2, %s2447_s25  ;;  %s426_s17 = scalar_lea.vmem [#allocation8], %s2444_s16 }
  0x95   : > { %s433_s7 = sshll.u32 %s426_s17, 4  ;;  %s2163_s29 = scalar_lea.hbm %s431_s11, 128  ;;  %s434_s7 = int_to_ptr.vmem [resolvable:$true] %s433_s7 }
  0x96   : > { %p2164_p4 = scmp.ne.s32.totalorder %s431_s11, %s2163_s29  ;;  %s2168_s27 = scalar_lea.hbm %s2737_s2, 256 }
  0x97   : > { %p2169_p6 = scmp.lt.s32.totalorder %s431_s11, %s2737_s2  ;;  %p2170_p9 = scmp.lt.s32.totalorder %s2168_s27, %s2163_s29 }
  0x98   : > { %p2166_p7 = pnand %p2164_p4, %p2795_p12 }
  0x99   : > { %p2171_p2 = por %p2170_p9, %p2169_p6 }
  0x9a   : > { %p2167_p3 = pneg %p2166_p7 }
  0x9c   : > { %p2172_p5 = pnand %p2171_p2, %p2167_p3 }
  0x9e   : > { %2175 = shalt.err (!%p2172_p5)
}
  0x9f   : > { %s2176_s16 = scalar_lea.vmem %s434_s7, 128  ;;  %s2277_s25 = smov [#allocation8]  }
  0xa0   : > { %p2177_p1 = scmp.ne.s32.totalorder %s434_s7, %s2176_s16  ;;  %s2181_s26 = sshll.u32 %s2277_s25, 4  ;;  %s2182_s26 = int_to_ptr.vmem [resolvable:$false] %s2181_s26 }
  0xa1   : > { %s2183_s12 = scalar_lea.vmem %s2182_s26, 256  ;;  %p2184_p11 = scmp.lt.s32.totalorder %s434_s7, %s2182_s26 }
  0xa2   : > { %p2179_p8 = pnand %p2177_p1, %p2795_p12  ;;  %p2185_p0 = scmp.lt.s32.totalorder %s2183_s12, %s2176_s16 }
  0xa4   : > { %p2180_p10 = pneg %p2179_p8  ;;  %p2186_p4 = por %p2185_p0, %p2184_p11 }
  0xa6   : > { %p2187_p7 = pnand %p2186_p4, %p2180_p10 }
  0xa8   : > { %2190 = shalt.err (!%p2187_p7)
}
  0xa9   : > { %1926 = dma.hbm_to_vmem [thread:$0]  (!%p2449_p13), %s431_s11, 128, %s434_s7, %s2463_s15  }
  0xaa   : > { %p2796_p3 = scmp.ne.s32.totalorder %s2775_s24, 0 }
  0xab   : > { %s2560_s0 = sand.u32 (!%p2796_p3), 1, %s2259_s18   ;;  %p2797_p12 = scmp.ne.s32.totalorder (!%p2796_p3), %s2781_s13, 0 }
  0xac   : > { %442 = sbr.rel (%p2796_p3) target bundleno = 1999 (0x7cf), region = 64  ;;  %s2563_s20 = sshll.u32 (!%p2796_p3), %s2560_s0, 3 }
  0xad   : > { %s445_s21 = scalar_lea.sflag (!%p2796_p3), [#allocation4], %s2560_s0  ;;  %s448_s1 = scalar_lea.vmem (!%p2796_p3), [#allocation3], %s2563_s20 }
  0xb1   : > { %2234 = dma.done.wait (%p2797_p12), %s445_s21, 128  }
  0xb2   : > { %2236 = vsyncadd (%p2797_p12), %s445_s21, 4294967168  ;;  %s453_s24 = sand.u32 1, %s2368_s23   ;;  %s457_s28 = scalar_lea.vmem [#allocation6], %s2563_s20 }
  0xb3   : > { %s454_s15 = scalar_lea.sflag [#allocation7], %s453_s24 }
  0xb4   : > { %2238 = dma.done.wait (%p2797_p12), %s454_s15, 256  }
  0xb5   : > { %2240 = vsyncadd (%p2797_p12), %s454_s15, 4294967040  ;;  %s466_s22 = scalar_lea.vmem [#allocation8], %s2563_s20  ;;  %p2798_p13 = scmp.eq.s32.totalorder %s2368_s23, 0 }
  0xb7   : > { %2242 = dma.done.wait (%p2798_p13), [#allocation10], 1024   ;;  %p2799_p6 = pmov %p2798_p13 }
  0xb9   : > { %2244 = vsyncadd (%p2799_p6), [#allocation10], 4294966272  ;;  %p2800_p9 = pmov %p2799_p6 }
  0xba   : > { %p2801_p2 = pmov %p2799_p6 }
  0xbb   : > { %2246 = dma.done.wait (%p2800_p9), [#allocation13], 1024  }
  0xbc   : > { %2248 = vsyncadd (%p2801_p2), [#allocation13], 4294966272  ;;  %v2278_v0 = vmov 0.0   ;;  %vm2279_vm0 = vmmov 0   ;;  %v622_v1 = vld [vmem:[#allocation11 + $0x18] sm:$0xff]  ;;  %v621_v3 = vld [vmem:[#allocation11 + $0x10] sm:$0xff] }
  0xbd   : > { %1807 = vmatprep.subr.mxu1 %v2278_v0  ;;  %1796 = vmatprep.subr.mxu0 %v2278_v0  ;;  %v537_v2 = vld [vmem:[#allocation9 + $0x18] sm:$0xff]  ;;  %v536_v4 = vld [vmem:[#allocation9 + $0x10] sm:$0xff]  ;;  %v620_v5 = vld [vmem:[#allocation11 + $0x8] sm:$0xff]  ;;  %vm545_vm1 = vcmask 261120   ;;  %vm787_vm2 = vcmask 64512   ;;  %s2280_s29 = smov 120  }
  0xbe   : > { %1815 = vmatprep.mubr.msk.f32.mxu1 %vm2279_vm0, %v2278_v0  ;;  %1804 = vmatprep.mubr.msk.f32.mxu0 %vm2279_vm0, %v2278_v0  ;;  %v535_v6 = vld [vmem:[#allocation9 + $0x8] sm:$0xff]  ;;  %v619_v7 = vld [vmem:[#allocation11] sm:$0xff]  ;;  %v531_v10 = vld [vmem:[%s448_s1] sm:$0xff]  ;;  %s2281_s30 = smov 112   ;;  %s2282_s10 = smov 104   ;;  %vm1119_vm3 = vcmask 130112  }
  0xbf   : > { %1808 = vmatpush3.msra.mxu1 %v622_v1  ;;  %1797 = vmatpush3.msra.mxu0 %v537_v2  ;;  %v534_v8 = vld [vmem:[#allocation9] sm:$0xff]  ;;  %v1738_v11 = vld [vmem:[%s2741_s6] ss:$0 sm:$0xff]  ;;  %v706_v19 = vld [vmem:[#allocation12 + $0x18] sm:$0xff]  ;;  %s2283_s16 = smov 8   ;;  %s2284_s25 = smov 16  }
  0xc0   : > { %1809 = vmatprep.subr.mxu1 %v2278_v0  ;;  %1798 = vmatprep.subr.mxu0 %v2278_v0  ;;  %v532_v9 = vld [vmem:[%s457_s28] sm:$0xff]  ;;  %v705_v20 = vld [vmem:[#allocation12 + $0x10] sm:$0xff]  ;;  %s2285_s26 = smov 24   ;;  %vm1290_vm4 = vcmask 195712   ;;  %vm1461_vm5 = vcmask 261312   ;;  %s2802_s1 = sld [smem:[#allocation30_spill]] }
  0xc1   : > { %1810 = vmatpush3.msra.mxu1 %v621_v3  ;;  %1799 = vmatpush3.msra.mxu0 %v536_v4  ;;  %v1736_v12 = vld [vmem:[%s2739_s4] ss:$0 sm:$0xff]  ;;  %v703_v22 = vld [vmem:[#allocation12] sm:$0xff]  ;;  %v533_v23 = vld [vmem:[%s466_s22] sm:$0xff]  ;;  %s1757_s24 = sshll.u32 %s2368_s23, 7  ;;  %s530_s15 = scalar_lea.vmem [#allocation15], %s2563_s20 }
  0xc2   : > { %1811 = vmatprep.subr.mxu1 %v2278_v0  ;;  %1800 = vmatprep.subr.mxu0 %v2278_v0  ;;  %v704_v21 = vld [vmem:[#allocation12 + $0x8] sm:$0xff]  ;;  %s1563_s28 = sshll.u32 %s530_s15, 4  ;;  %s2803_s11 = sld [smem:[#allocation31_spill]]  ;;  %s1564_s28 = int_to_ptr.vmem [resolvable:$true] %s1563_s28 }
  0xc3   : > { %1812 = vmatpush3.msra.mxu1 %v620_v5  ;;  %1801 = vmatpush3.msra.mxu0 %v535_v6  ;;  %v1740_v32 = vld [vmem:[%s2743_s8] ss:$0 sm:$0xff]  ;;  %s1550_s7 = scalar_lea.sflag [#allocation5], %s2560_s0  ;;  %p2804_p1 = scmp.ne.s32.totalorder %s2782_s14, 0 }
  0xc4   : > { %1813 = vmatprep.subr.mxu1 %v2278_v0  ;;  %1802 = vmatprep.subr.mxu0 %v2278_v0  ;;  %s2286_s23 = smov [#allocation15]  }
  0xc5   : > { %1814 = vmatpush3.msra.mxu1 %v619_v7  ;;  %1803 = vmatpush3.msra.mxu0 %v534_v8  ;;  %s2195_s20 = sshll.u32 %s2286_s23, 4  ;;  %s2196_s20 = int_to_ptr.vmem [resolvable:$false] %s2195_s20 }
  0xc6   : > { %1816 = vmatmul.mubr.msk.f32.vlgmr.msra.gmra.mxu1 %vm545_vm1, %v532_v9  ;;  %1805 = vmatmul.mubr.msk.f32.vlgmr.msra.gmra.mxu0 %vm545_vm1, %v531_v10  ;;  %p2198_p11 = scmp.lt.s32.totalorder %s1564_s28, %s2196_s20 }
  0xc7   : > { %1829 = vmatprep.subr.mxu1 %v2278_v0  ;;  %1831 = vmatprep.mubr.msk.f32.mxu1 %vm2279_vm0, %v2278_v0 }
  0xc8   : > { %1818 = vmatprep.subr.mxu0 %v2278_v0  ;;  %1826 = vmatprep.mubr.msk.f32.mxu0 %vm2279_vm0, %v2278_v0  ;;  %s2697_s17 = scalar_lea.hbm %s2803_s11, %s1757_s24 }
  0xc9   : > { %1819 = vmatpush3.msra.mxu0 %v706_v19 }
  0xca   : > { %1820 = vmatprep.subr.mxu0 %v2278_v0 }
  0xcb   : > { %1821 = vmatpush3.msra.mxu0 %v705_v20  ;;  %v1467_v20 = vld [vmem:[#allocation14 + $0x18] sm:$0xff] }
  0xcc   : > { %1822 = vmatprep.subr.mxu0 %v2278_v0 }
  0xcd   : > { %1823 = vmatpush3.msra.mxu0 %v704_v21  ;;  %v1466_v21 = vld [vmem:[#allocation14 + $0x10] sm:$0xff] }
  0xce   : > { %1824 = vmatprep.subr.mxu0 %v2278_v0 }
  0xcf   : > { %1825 = vmatpush3.msra.mxu0 %v703_v22  ;;  %v1465_v22 = vld [vmem:[#allocation14 + $0x8] sm:$0xff] }
  0xd0   : > { %1827 = vmatmul.mubr.msk.f32.vlgmr.msra.gmra.mxu0 %vm545_vm1, %v533_v23  ;;  %1849 = vmatprep.subr.mxu0 %v2278_v0 }
  0xd1   : > { %1851 = vmatprep.mubr.msk.f32.mxu0 %vm2279_vm0, %v2278_v0 }
 0x186   : > { %v699_v13 = vpop.f32.mrf.mxu1  ;;  %v615_v14 = vpop.f32.mrf.mxu0 }
 0x187   : > { %v700_v15 = vadd.f32 %v1738_v11, %v699_v13  ;;  %v616_v16 = vadd.f32 %v1736_v12, %v615_v14 }
 0x188   : > { %v1817_v17 = vpop.f32.mrf.mxu1  ;;  %v1806_v18 = vpop.f32.mrf.mxu0 }
 0x189   : > { %951 = vrot.lane.b32.xlu1 %v700_v15, %s2280_s29  ;;  %1830 = vmatpush3.xpose.msk.msra.mxu1 %vm787_vm2, %v700_v15 }
 0x18a   : > { %1834 = vmatprep.subr.mxu1 %v2278_v0 }
 0x18c   : > { %1832 = vmatmul.mubr.msk.f32.vlgmr.msra.gmra.mxu1 %vm787_vm2, %v616_v16 }
 0x18d   : > { %949 = vrot.lane.b32.xlu1 %v616_v16, %s2280_s29  ;;  %1836 = vmatprep.mubr.msk.f32.mxu1 %vm2279_vm0, %v2278_v0 }
 0x190   : > { %v783_v33 = vpop.f32.mrf.mxu0 }
 0x191   : > { %1121 = vrot.lane.b32.xlu1 %v616_v16, %s2281_s30  ;;  %v2640_v34 = vadd.f32 %v1740_v32, %v783_v33  ;;  %v1754_v33 = vld [vmem:[%s2802_s1] ss:$0 sm:$0xff] }
 0x192   : > { %v1828_v35 = vpop.f32.mrf.mxu0 }
 0x193   : > { %1835 = vmatpush3.msra.mxu1 %v2640_v34 }
 0x194   : > { %1839 = vmatprep.subr.mxu1 %v2278_v0 }
 0x195   : > { %1294 = vrot.lane.b32.xlu1 %v700_v15, %s2282_s10 }
 0x199   : > { %1292 = vrot.lane.b32.xlu1 %v616_v16, %s2282_s10 }
 0x1fb   : > { %v952_v36 = vpop.permute.xlu1 %951 }
 0x1ff   : > { %v950_v37 = vpop.permute.xlu1 %949 }
 0x203   : > { %v1122_v38 = vpop.permute.xlu1 %1121 }
 0x207   : > { %v1295_v41 = vpop.permute.xlu1 %1294 }
 0x20b   : > { %v1293_v42 = vpop.permute.xlu1 %1292 }
 0x24c   : > { %v860_v24 = vpop.f32.mrf.mxu1 }
 0x24d   : > { %v864_v25 = vsel %vm787_vm2, %v860_v24, -inf }
 0x24e   : > { %865 = vmax.xlane.f32.xlu0 %v864_v25  ;;  %v1833_v26 = vpop.f32.mrf.mxu1 }
 0x2d7   : > { %v866_v27 = vpop.xlane.xlu0 %865 }
 0x2d8   : > { %v867_v28 = vsub.f32 %v860_v24, %v866_v27  ;;  %v1464_v24 = vld [vmem:[#allocation14] sm:$0xff] }
 0x2da   : > { %v868_v29 = vmul.f32 1.442695, %v867_v28 }
 0x2dc   : > { %1987 = vpow2.f32 %v868_v29 }
 0x2e9   : > { %v1988_v30 = vpop.eup %1987 }
 0x2ea   : > { %v870_v31 = vsel %vm787_vm2, %v1988_v30, 0.0 }
 0x2eb   : > { %871 = vadd.xlane.f32.xlu0 %v870_v31 }
 0x301   : > { %1123 = vrot.lane.b32.xlu0 %v700_v15, %s2281_s30 }
 0x374   : > { %v872_v39 = vpop.xlane.xlu0 %871 }
 0x375   : > { %1989 = vrcp.f32 %v872_v39 }
 0x378   : > { %v1124_v40 = vpop.permute.xlu0 %1123 }
 0x379   : > { %1850 = vmatpush3.xpose.msk.msra.mxu0 %vm787_vm2, %v1124_v40 }
 0x37a   : > { %1859 = vmatprep.subr.mxu0 %v2278_v0 }
 0x37c   : > { %1852 = vmatmul.mubr.msk.f32.vlgmr.msra.gmra.mxu0 %vm787_vm2, %v1122_v38 }
 0x37d   : > { %1860 = vmatpush3.xpose.msk.msra.mxu0 %vm787_vm2, %v1295_v41  ;;  %1861 = vmatprep.mubr.msk.f32.mxu0 %vm2279_vm0, %v2278_v0 }
 0x37e   : > { %1869 = vmatprep.subr.mxu0 %v2278_v0 }
 0x380   : > { %1862 = vmatmul.mubr.msk.f32.vlgmr.msra.gmra.mxu0 %vm787_vm2, %v1293_v42 }
 0x381   : > { %1877 = vmatprep.mubr.msk.f32.mxu0 %vm2279_vm0, %v2278_v0  ;;  %1870 = vmatpush3.msra.mxu0 %v1467_v20 }
 0x382   : > { %v1990_v43 = vpop.eup %1989  ;;  %1871 = vmatprep.subr.mxu0 %v2278_v0 }
 0x383   : > { %v874_v44 = vmul.f32 %v1990_v43, %v1988_v30  ;;  %1872 = vmatpush3.msra.mxu0 %v1466_v21 }
 0x384   : > { %1873 = vmatprep.subr.mxu0 %v2278_v0 }
 0x385   : > { %1837 = vmatmul.mubr.msk.f32.vlgmr.msra.gmra.mxu1 %vm787_vm2, %v874_v44  ;;  %1874 = vmatpush3.msra.mxu0 %v1465_v22 }
 0x386   : > { %1840 = vmatpush3.xpose.msk.msra.mxu1 %vm787_vm2, %v952_v36  ;;  %1841 = vmatprep.mubr.msk.f32.mxu1 %vm2279_vm0, %v2278_v0 }
 0x387   : > { %1844 = vmatprep.subr.mxu1 %v2278_v0  ;;  %1875 = vmatprep.subr.mxu0 %v2278_v0 }
 0x388   : > { %1876 = vmatpush3.msra.mxu0 %v1464_v24 }
 0x389   : > { %1842 = vmatmul.mubr.msk.f32.vlgmr.msra.gmra.mxu1 %vm787_vm2, %v950_v37 }
 0x38a   : > { %1846 = vmatprep.mubr.msk.f32.mxu1 %vm2279_vm0, %v2278_v0 }
 0x43c   : > { %v1195_v45 = vpop.f32.mrf.mxu0 }
 0x43d   : > { %v1199_v46 = vsel %vm787_vm2, %v1195_v45, -inf }
 0x43e   : > { %1200 = vmax.xlane.f32.xlu0 %v1199_v46  ;;  %v1853_v47 = vpop.f32.mrf.mxu0 }
 0x440   : > { %v1366_v48 = vpop.f32.mrf.mxu0 }
 0x441   : > { %v1370_v55 = vsel %vm787_vm2, %v1366_v48, -inf }
 0x442   : > { %v1863_v49 = vpop.f32.mrf.mxu0 }
 0x445   : > { %v944_v50 = vpop.f32.mrf.mxu1 }
 0x446   : > { %948 = vst.msk [vmem:[#allocation2] sm:$0xff] %vm787_vm2, %v944_v50 }
 0x447   : > { %v1838_v51 = vpop.f32.mrf.mxu1 }
 0x449   : > { %v1023_v52 = vpop.f32.mrf.mxu1 }
 0x44a   : > { %v1027_v53 = vsel %vm787_vm2, %v1023_v52, -inf }
 0x44b   : > { %1028 = vmax.xlane.f32.xlu1 %v1027_v53  ;;  %v1843_v54 = vpop.f32.mrf.mxu1 }
 0x44f   : > { %1371 = vmax.xlane.f32.xlu1 %v1370_v55 }
 0x4c7   : > { %v1201_v56 = vpop.xlane.xlu0 %1200 }
 0x4c8   : > { %v1202_v57 = vsub.f32 %v1195_v45, %v1201_v56 }
 0x4ca   : > { %v1203_v58 = vmul.f32 1.442695, %v1202_v57 }
 0x4cc   : > { %1991 = vpow2.f32 %v1203_v58 }
 0x4d4   : > { %v1029_v59 = vpop.xlane.xlu1 %1028 }
 0x4d5   : > { %v1030_v4 = vsub.f32 %v1023_v52, %v1029_v59 }
 0x4d7   : > { %v1031_v5 = vmul.f32 1.442695, %v1030_v4 }
 0x4d8   : > { %v1372_v60 = vpop.xlane.xlu1 %1371 }
 0x4d9   : > { %v1992_v61 = vpop.eup %1991  ;;  %v1373_v62 = vsub.f32 %v1366_v48, %v1372_v60 }
 0x4da   : > { %v1205_v63 = vsel %vm787_vm2, %v1992_v61, 0.0 }
 0x4db   : > { %v1374_v1 = vmul.f32 1.442695, %v1373_v62  ;;  %1206 = vadd.xlane.f32.xlu0 %v1205_v63 }
 0x4dd   : > { %1993 = vpow2.f32 %v1374_v1 }
 0x4de   : > { %1995 = vpow2.f32 %v1031_v5 }
 0x4ea   : > { %v1994_v2 = vpop.eup %1993 }
 0x4eb   : > { %v1376_v3 = vsel %vm787_vm2, %v1994_v2, 0.0  ;;  %v1996_v6 = vpop.eup %1995 }
 0x4ec   : > { %1377 = vadd.xlane.f32.xlu1 %v1376_v3  ;;  %v1033_v7 = vsel %vm787_vm2, %v1996_v6, 0.0 }
 0x4f1   : > { %1039 = vrot.lane.b32.xlu0 %v2640_v34, %s2280_s29  ;;  %s2191_s29 = scalar_lea.vmem %s1564_s28, 128 }
 0x4f2   : > { %p2192_p5 = scmp.ne.s32.totalorder %s1564_s28, %s2191_s29 }
 0x4f4   : > { %p2193_p8 = pnand %p2192_p5, %p2804_p1 }
 0x4f6   : > { %p2194_p10 = pneg %p2193_p8 }
 0x4fd   : > { %1210 = vrot.lane.b32.xlu1 %v2640_v34, %s2281_s30  ;;  %s2197_s30 = scalar_lea.vmem %s2196_s20, 256 }
 0x4fe   : > { %p2199_p0 = scmp.lt.s32.totalorder %s2197_s30, %s2191_s29 }
 0x500   : > { %p2200_p4 = por %p2199_p0, %p2198_p11 }
 0x502   : > { %p2201_p7 = pnand %p2200_p4, %p2194_p10 }
 0x521   : > { %1034 = vadd.xlane.f32.xlu1 %v1033_v7 }
 0x532   : > { %1381 = vrot.lane.b32.xlu1 %v2640_v34, %s2282_s10 }
 0x564   : > { %v1207_v8 = vpop.xlane.xlu0 %1206 }
 0x568   : > { %v1040_v9 = vpop.permute.xlu0 %1039 }
 0x569   : > { %1845 = vmatpush3.msra.mxu1 %v1040_v9 }
 0x56a   : > { %1854 = vmatprep.subr.mxu1 %v2278_v0 }
 0x575   : > { %v1378_v10 = vpop.xlane.xlu1 %1377 }
 0x579   : > { %v1211_v11 = vpop.permute.xlu1 %1210 }
 0x5aa   : > { %v1035_v12 = vpop.xlane.xlu1 %1034 }
 0x5ab   : > { %1997 = vrcp.f32 %v1035_v12 }
 0x5ac   : > { %1999 = vrcp.f32 %v1207_v8 }
 0x5ad   : > { %2001 = vrcp.f32 %v1378_v10 }
 0x5ae   : > { %v1382_v18 = vpop.permute.xlu1 %1381 }
 0x5b8   : > { %v1998_v13 = vpop.eup %1997 }
 0x5b9   : > { %v1037_v14 = vmul.f32 %v1998_v13, %v1996_v6  ;;  %v2000_v15 = vpop.eup %1999 }
 0x5ba   : > { %v1209_v16 = vmul.f32 %v2000_v15, %v1992_v61  ;;  %v2002_v17 = vpop.eup %2001 }
 0x5bb   : > { %1847 = vmatmul.mubr.msk.f32.vlgmr.msra.gmra.mxu1 %vm787_vm2, %v1037_v14  ;;  %v1380_v19 = vmul.f32 %v2002_v17, %v1994_v2 }
 0x5bc   : > { %1855 = vmatpush3.msra.mxu1 %v1211_v11  ;;  %1856 = vmatprep.mubr.msk.f32.mxu1 %vm2279_vm0, %v2278_v0 }
 0x5bd   : > { %1864 = vmatprep.subr.mxu1 %v2278_v0 }
 0x5bf   : > { %1857 = vmatmul.mubr.msk.f32.vlgmr.msra.gmra.mxu1 %vm787_vm2, %v1209_v16 }
 0x5c0   : > { %1865 = vmatpush3.msra.mxu1 %v1382_v18  ;;  %1866 = vmatprep.mubr.msk.f32.mxu1 %vm2279_vm0, %v2278_v0 }
 0x5c3   : > { %1867 = vmatmul.mubr.msk.f32.vlgmr.msra.gmra.mxu1 %vm787_vm2, %v1380_v19 }
 0x67b   : > { %v1111_v23 = vpop.f32.mrf.mxu1 }
 0x67c   : > { %1116 = vrot.lane.b32.xlu0 %v1111_v23, %s2283_s16 }
 0x67d   : > { %v1848_v25 = vpop.f32.mrf.mxu1 }
 0x67f   : > { %v1282_v26 = vpop.f32.mrf.mxu1 }
 0x680   : > { %1287 = vrot.lane.b32.xlu1 %v1282_v26, %s2284_s25 }
 0x681   : > { %v1858_v27 = vpop.f32.mrf.mxu1 }
 0x683   : > { %v1453_v28 = vpop.f32.mrf.mxu1 }
 0x684   : > { %1458 = vrot.lane.b32.xlu0 %v1453_v28, %s2285_s26 }
 0x685   : > { %v1868_v29 = vpop.f32.mrf.mxu1 }
 0x6ee   : > { %v1117_v30 = vpop.permute.xlu0 %1116 }
 0x6ef   : > { %1120 = vst.msk [vmem:[#allocation2] sm:$0xff] %vm1119_vm3, %v1117_v30 }
 0x6f2   : > { %v1288_v31 = vpop.permute.xlu1 %1287 }
 0x6f3   : > { %1291 = vst.msk [vmem:[#allocation2] sm:$0xff] %vm1290_vm4, %v1288_v31 }
 0x6f6   : > { %v1459_v0 = vpop.permute.xlu0 %1458 }
 0x6f7   : > { %1462 = vst.msk [vmem:[#allocation2] sm:$0xff] %vm1461_vm5, %v1459_v0 }
 0x6fe   : > { %v1463_v32 = vld [vmem:[#allocation2] sm:$0xff] }
 0x6ff   : > { %1878 = vmatmul.mubr.msk.f32.vlgmr.msra.gmra.mxu0 %vm545_vm1, %v1463_v32 }
 0x7bf   : > { %v1544_v34 = vpop.f32.mrf.mxu0 }
 0x7c0   : > { %v1545_v35 = vadd.f32 %v1754_v33, %v1544_v34 }
 0x7c1   : > { %v1879_v36 = vpop.f32.mrf.mxu0 }
 0x7c2   : > { %1548 = vst.msk [vmem:[%s530_s15] sm:$0xff] %vm545_vm1, %v1545_v35 }
 0x7c3   : > { %2204 = shalt.err (!%p2201_p7)
}
 0x7c4   : > { %s2205_s10 = scalar_lea.hbm %s2697_s17, 128  ;;  %s2209_s3 = scalar_lea.hbm %s2803_s11, 256 }
 0x7c5   : > { %p2206_p3 = scmp.ne.s32.totalorder %s2697_s17, %s2205_s10  ;;  %p2210_p6 = scmp.lt.s32.totalorder %s2697_s17, %s2803_s11 }
 0x7c6   : > { %p2211_p9 = scmp.lt.s32.totalorder %s2209_s3, %s2205_s10 }
 0x7c7   : > { %p2207_p12 = pnand %p2206_p3, %p2804_p1 }
 0x7c8   : > { %p2212_p2 = por %p2211_p9, %p2210_p6 }
 0x7c9   : > { %p2208_p13 = pneg %p2207_p12 }
 0x7cb   : > { %p2213_p5 = pnand %p2212_p2, %p2208_p13 }
 0x7cd   : > { %2216 = shalt.err (!%p2213_p5)
}
 0x7ce   : > { %1902 = dma.vmem_to_hbm [thread:$0]  (%p2804_p1), %s1564_s28, 128, %s2697_s17, %s1550_s7  }
 0x7cf PF: > { %s2805_s26 = sld [smem:[#allocation21_spill]] }
 0x7d0   : > { %s2806_s12 = sld [smem:[#allocation25_spill]] }
 0x7d1   : > { %s2807_s21 = sld [smem:[#allocation22_spill]] }
 0x7d5   : > { %s1575_s1 = sand.u32 1, %s2805_s26  }
 0x7d6   : > { %p2808_p8 = scmp.ne.s32.totalorder %s2806_s12, 0  ;;  %s1576_s24 = scalar_lea.sflag [#allocation5], %s1575_s1 }
 0x7d7   : > { %p2809_p10 = scmp.ge.s32.totalorder %s2807_s21, 2 }
 0x7d9   : > { %p1928_p11 = pnand %p2809_p10, %p2808_p8 }
 0x7db   : > { %p1929_p0 = pneg %p1928_p11 }
 0x7dd   : > { %2250 = dma.done.wait (%p1929_p0), %s1576_s24, 128  }
 0x7de   : > { %2252 = vsyncadd (%p1929_p0), %s1576_s24, 4294967168  ;;  %s2810_s20 = sld [smem:[#allocation23_spill]]  ;;  %s2812_s17 = smov %s2259_s18 }
 0x7df   : > { %s2811_s15 = sld [smem:[#allocation24_spill]]  ;;  %s2813_s18 = smov %s2263_s19 }
 0x7e4   : > { %p29_p4 = scmp.ge.s32.totalorder %s2810_s20, 4  }
 0x7e5   : > { %s2814_s19 = smov %s2811_s15 }
 0x7e6   :  { %31 = sbr.rel (!%p29_p4) target bundleno = 16 (0x10), region = 149 }
 0x7eb   :  { %1581 = vsyncpa [#allocation4], 1 }
 0x7ec   :  { %1583 = vsyncpa [#allocation4 + $0x1], 1 }
 0x7ed   :  { %1584 = vsyncpa [#allocation7], 1 }
 0x7ee   :  { %1586 = vsyncpa [#allocation7 + $0x1], 1 }
 0x7ef   :  { %1587 = vsyncpa [#allocation10], 1 }
 0x7f0   :  { %1588 = vsyncpa [#allocation13], 1 }
 0x7f1   :  { %1589 = vsyncpa [#allocation5], 1 }
 0x7f2   :  { %1591 = vsyncpa [#allocation5 + $0x1], 1 }

</bundles_post_ra>
